<compile_context>
chip_gen: v5e
topology: v5e:2x2
jax: 0.10.0
libtpu: 0.0.40
codegen_flags: <defaults>
</compile_context>

<pallas_src>
import functools
import math

import jax
import jax.numpy as jnp
from jax.experimental import pallas as pl
from jax.experimental.pallas import tpu as pltpu


def _cdiv(a, b):
    return -(-a // b)


# ---------------------------------------------------------------------------
# Pallas kernel: one (Cout-tile, batch, row-tile) block -> one fused matmul.
# ---------------------------------------------------------------------------
def _conv2d_block_kernel(*refs, TH, W, KH, KW, has_halo):
    # has_halo=True : x_main (TH, Wp, Cin), x_halo (KH-1, Wp, Cin), w, b, o
    # has_halo=False: x (TH+KH-1, Wp, Cin), w, b, o
    #   w_ref: (TCO, KH*KW*Cin) bf16   (resident: block index only changes with co)
    #   b_ref: (TCO, 1)         f32
    #   o_ref: (TCO, TH*W)      f32    (channel-major, lane-dense spatial dim)
    if has_halo:
        x_main_ref, x_halo_ref, w_ref, b_ref, o_ref = refs
        x = jnp.concatenate([x_main_ref[...], x_halo_ref[...]], axis=0)
    else:
        x_ref, w_ref, b_ref, o_ref = refs
        x = x_ref[...]
    Cin = x.shape[-1]

    # Window-only im2col with all KH*KW taps fused into the contraction dim
    # (K = KH*KW*Cin) -> ONE MXU contraction per block, f32 accumulation.
    # TODO(synk): for very small Cin the NHWC lane dim is sparse (Cin/128 useful
    # lanes); a lane-dense K layout (KW*Cin prefold or W-on-lanes) and, for
    # large Cin on v7x, a per-tap accumulating decomposition are further wins.
    taps = [x[kh:kh + TH, kw:kw + W, :] for kh in range(KH) for kw in range(KW)]
    lhs = jnp.concatenate(taps, axis=-1).reshape(TH * W, KH * KW * Cin)

    # (TCO, M): contract K on both operands (same pattern as attention's Q.K^T);
    # the result is already channel-major, so it stores lane-dense straight into
    # the NCHW output - no Cout padding, no wrapper transpose.
    acc = jax.lax.dot_general(
        w_ref[...], lhs,
        dimension_numbers=(((1,), (1,)), ((), ())),
        preferred_element_type=jnp.float32)
    acc = acc + b_ref[...]                       # (TCO, 1) bias, f32 epilogue
    o_ref[...] = acc.astype(o_ref.dtype)


# ---------------------------------------------------------------------------
# Flexible per-dimension padding (mirrors the torch.nn.functional.pad loop).
# ---------------------------------------------------------------------------
_PAD_MODE_MAP = {
    "constant": "constant",   # zero padding
    "zeros": "constant",
    "reflect": "reflect",
    "replicate": "edge",
    "circular": "wrap",
}


def pad_flexible(x, padding, padding_modes):
    """Pads the last len(padding) dims of x, one axis at a time, last axis first."""
    n = len(padding)
    for i in range(n):
        p = padding[-i - 1]
        mode = padding_modes[-i - 1]
        axis = x.ndim - 1 - i
        pad_width = [(0, 0)] * x.ndim
        pad_width[axis] = (p, p)
        x = jnp.pad(x, pad_width, mode=_PAD_MODE_MAP[mode])
    return x


# ---------------------------------------------------------------------------
# Tiling heuristics.
# ---------------------------------------------------------------------------
def _pick_row_tile(H_out, W_out, Wp, Cin, KH, KW, TCO):
    """Pick TH (output rows per block) and n_h (number of row tiles)."""
    M_TARGET = 1024                      # 512-2048 output rows per block
    VMEM_BUDGET = 24 * 1024 * 1024       # safe for v7x's 64 MiB (32 MiB scoped)

    def pad8(n):
        return _cdiv(n, 8) * 8

    def pad128(n):
        return _cdiv(n, 128) * 128

    def block_bytes(th):
        # (8,128)-tiled VMEM footprint, 2x double buffering on in/out blocks,
        # plus the in-kernel im2col lhs and the f32 accumulator.
        rows_in = th + KH - 1
        m = th * W_out
        k = KH * KW * Cin
        in_blk = rows_in * pad8(Wp) * pad128(Cin) * 2
        out_blk = pad8(TCO) * pad128(m) * 4
        w_blk = pad8(TCO) * pad128(k) * 2
        lhs_tmp = pad8(m) * pad128(k) * 2
        acc_tmp = pad8(TCO) * pad128(m) * 4
        return 2 * (in_blk + out_blk) + 2 * w_blk + lhs_tmp + acc_tmp

    # TH granularity so TH*W_out is a multiple of 128 (lane-dense output stores
    # and a legal flattened-spatial out BlockSpec when n_h > 1).  M_TARGET=1024
    # also keeps M a multiple of 256 for the v6e/v7x 256-wide MXU when possible.
    g = 128 // math.gcd(W_out, 128)
    th_min = max(g, _cdiv(max(KH - 1, 1), g) * g)   # halo must fit in one tile
    th = max(th_min, (max(M_TARGET // W_out, 1)) // g * g)
    while th > th_min and block_bytes(th) > VMEM_BUDGET:
        th -= g
    if th >= H_out:
        return H_out, 1                  # whole image in a single row tile
    return th, _cdiv(H_out, th)


# ---------------------------------------------------------------------------
# Jitted forward: pad -> layout -> pallas conv -> un-pad. One XLA program.
# ---------------------------------------------------------------------------
def _forward_impl(x, weight, bias, padding, padding_modes):
    # x: (B, Cin, H, W) f32 | weight: (Cout, Cin, KH, KW) f32 | bias: (Cout,) f32
    xp = pad_flexible(x, padding, padding_modes)          # NCHW, flexible modes
    B, Cin, Hp, Wp = xp.shape
    Cout, _, KH, KW = weight.shape
    H_out = Hp - KH + 1
    W_out = Wp - KW + 1
    K = KH * KW * Cin

    # --- Cout tiling: only tile (and pad) when Cout is large ------------------
    if Cout > 256:
        TCO = 256          # v6e/v7x MXU width; 128 would be the v5e-tuned choice
        n_co = _cdiv(Cout, TCO)
        Cout_pad = n_co * TCO
    else:
        TCO, n_co, Cout_pad = Cout, 1, Cout

    # --- row tiling ------------------------------------------------------------
    TH, n_h = _pick_row_tile(H_out, W_out, Wp, Cin, KH, KW, TCO)
    M = TH * W_out
    has_halo = n_h > 1

    # --- input: NCHW -> NHWC bf16 (documented precision change) ---------------
    x_nhwc = jnp.transpose(xp, (0, 2, 3, 1)).astype(jnp.bfloat16)

    if has_halo:
        # Free reshape into row tiles; one extra zero tile so every tile's halo
        # (the first KH-1 rows of the NEXT tile) has a valid source.  No halo
        # rows are duplicated in HBM; they are simply re-read (KH-1 rows/tile).
        H_store = (n_h + 1) * TH
        x_nhwc = jnp.pad(x_nhwc, ((0, 0), (0, H_store - Hp), (0, 0), (0, 0)))
        x_tiles = x_nhwc.reshape(B, n_h + 1, TH, Wp, Cin)
        in_specs = [
            pl.BlockSpec((None, None, TH, Wp, Cin),
                         lambda co, b, h: (b, h, 0, 0, 0)),
            pl.BlockSpec((None, None, KH - 1, Wp, Cin),
                         lambda co, b, h: (b, h + 1, 0, 0, 0)),
        ]
        x_args = (x_tiles, x_tiles)
    else:
        in_specs = [
            pl.BlockSpec((None, Hp, Wp, Cin), lambda co, b, h: (b, 0, 0, 0)),
        ]
        x_args = (x_nhwc,)

    # --- weights: OIHW -> (Cout, KH*KW*Cin) bf16; bias (Cout, 1) f32 -----------
    w2 = jnp.transpose(weight, (0, 2, 3, 1)).reshape(Cout, K)   # K order (kh,kw,ci)
    b2 = bias
    if Cout_pad > Cout:
        w2 = jnp.pad(w2, ((0, Cout_pad - Cout), (0, 0)))
        b2 = jnp.pad(b2, (0, Cout_pad - Cout))
    w2 = w2.astype(jnp.bfloat16)
    b2 = b2.reshape(Cout_pad, 1).astype(jnp.float32)

    # Weight/bias blocks depend only on co (the OUTERMOST grid axis) -> they are
    # fetched n_co times total and stay resident across all (b, h) steps.
    w_spec = pl.BlockSpec((TCO, K), lambda co, b, h: (co, 0))
    b_spec = pl.BlockSpec((TCO, 1), lambda co, b, h: (co, 0))
    # Output: NCHW with the per-tile spatial dim flattened on lanes (M % 128 == 0
    # whenever n_h > 1) -> unmasked lane-dense stores, no Cout padding.
    out_spec = pl.BlockSpec((None, TCO, M), lambda co, b, h: (b, co, h))

    kern = functools.partial(_conv2d_block_kernel,
                             TH=TH, W=W_out, KH=KH, KW=KW, has_halo=has_halo)

    # Real (unpadded) work for the scheduler hint.
    flops = 2 * B * H_out * W_out * K * Cout
    bytes_accessed = (B * Hp * Wp * Cin * 2 + Cout * K * 2 + Cout * 4
                      + B * Cout * H_out * W_out * 4)

    # TODO(synk): if the input DMA is still exposed at these block sizes, sweep
    # pipeline_mode=pl.Buffered(3) on the input BlockSpec.
    out = pl.pallas_call(
        kern,
        out_shape=jax.ShapeDtypeStruct((B, Cout_pad, n_h * M), jnp.float32),
        grid=(n_co, B, n_h),
        in_specs=in_specs + [w_spec, b_spec],
        out_specs=out_spec,
        compiler_params=pltpu.CompilerParams(
            dimension_semantics=("parallel", "parallel", "parallel")),
        cost_estimate=pl.CostEstimate(flops=flops, transcendentals=0,
                                      bytes_accessed=bytes_accessed),
    )(*x_args, w2, b2)

    # Free reshape back to (B, Cout, H, W); strip bottom row padding (and Cout
    # padding only in the rare Cout > 256 case).
    out = out.reshape(B, Cout_pad, n_h * TH, W_out)[:, :Cout, :H_out, :]
    return out


_forward_jit = jax.jit(_forward_impl, static_argnums=(3, 4))


# ---------------------------------------------------------------------------
# Module equivalent.
# ---------------------------------------------------------------------------
class ConvNdWithFlexiblePadding:
    """JAX/Pallas port of the PyTorch ConvNdWithFlexiblePadding (N=2 supported)."""

    def __init__(self, N, padding, padding_modes, *, in_channels, out_channels,
                 kernel_size, key):
        if len(padding) != N:
            raise ValueError(f"`padding` must have length {N}, but was {len(padding)}")
        if len(padding_modes) != N:
            raise ValueError(f"`padding_modes` must have length {N}, but was {len(padding_modes)}")
        if N != 2:
            # TODO(synk): N=1 and N=3 conv variants not implemented in this Pallas port.
            raise NotImplementedError("Only N=2 (Conv2d) is implemented in the Pallas port")

        self.N = N
        self.padding_ = tuple(padding)
        self.padding_modes = tuple(padding_modes)
        self.kernel_size = (kernel_size, kernel_size) if isinstance(kernel_size, int) else tuple(kernel_size)

        # Deterministic init mimicking PyTorch's Conv2d default (kaiming-uniform bounds).
        kh, kw = self.kernel_size
        fan_in = in_channels * kh * kw
        bound = 1.0 / (fan_in ** 0.5)
        k_w, k_b = jax.random.split(key)
        # PyTorch weight layout: (Cout, Cin, KH, KW)
        self.weight = jax.random.uniform(
            k_w, (out_channels, in_channels, kh, kw), jnp.float32, -bound, bound)
        self.bias = jax.random.uniform(k_b, (out_channels,), jnp.float32, -bound, bound)

    def __call__(self, image_nchw):
        # TODO(synk): stride / dilation / groups other than the Conv2d defaults
        # (1, 1, 1) are not implemented in this Pallas port.
        return _forward_jit(image_nchw, self.weight, self.bias,
                            self.padding_, self.padding_modes)


# ---------------------------------------------------------------------------
# Demo / self-check
# ---------------------------------------------------------------------------
if __name__ == "__main__":
    key = jax.random.PRNGKey(0)
    k_x, k_mod = jax.random.split(key)

    B, Cin, H, W = 2, 4, 16, 16
    Cout, Ksz = 8, 3
    padding = (1, 1)
    padding_modes = ("circular", "reflect")   # different mode per spatial dim

    x = jax.random.normal(k_x, (B, Cin, H, W), jnp.float32)

    module = ConvNdWithFlexiblePadding(
        2, padding, padding_modes,
        in_channels=Cin, out_channels=Cout, kernel_size=Ksz, key=k_mod)

    out = module(x)
    out = jax.block_until_ready(out)
    assert out.shape == (B, Cout, H, W), out.shape

    # Pure-JAX reference: same flexible padding + VALID conv, with matching
    # bf16 operands / f32 accumulation for an apples-to-apples check.
    xp_ref = pad_flexible(x, padding, padding_modes).astype(jnp.bfloat16)
    w_ref = module.weight.astype(jnp.bfloat16)
    ref = jax.lax.conv_general_dilated(
        xp_ref, w_ref, window_strides=(1, 1), padding="VALID",
        dimension_numbers=("NCHW", "OIHW", "NCHW"),
        preferred_element_type=jnp.float32,
    ) + module.bias[None, :, None, None]

    max_err = float(jnp.max(jnp.abs(out - ref)))
    assert jnp.allclose(out, ref, atol=5e-2, rtol=5e-2), max_err

    print("KERNEL_OK")
</pallas_src>

<mosaic_0001>
module attributes {stable_mosaic.version = 11 : i64} {
  func.func @_conv2d_block_kernel(%arg0: i32, %arg1: i32, %arg2: i32, %arg3: memref<1x18x18x4xbf16, #tpu.memory_space<vmem>>, %arg4: memref<8x36xbf16, #tpu.memory_space<vmem>>, %arg5: memref<8x1xf32, #tpu.memory_space<vmem>>, %arg6: memref<1x8x256xf32, #tpu.memory_space<vmem>>) attributes {dimension_semantics = [#tpu.dimension_semantics<parallel>, #tpu.dimension_semantics<parallel>, #tpu.dimension_semantics<parallel>], iteration_bounds = array<i64: 1, 2, 1>, scalar_prefetch = 0 : i64, scratch_operands = 0 : i64, tpu.core_type = #tpu.core_type<tc>, window_params = [{transform_indices = @transform_0, window_bounds = array<i64: 1, 18, 18, 4>}, {transform_indices = @transform_1, window_bounds = array<i64: 8, 36>}, {transform_indices = @transform_2, window_bounds = array<i64: 8, 1>}, {transform_indices = @transform_3, window_bounds = array<i64: 1, 8, 256>}]} {
    %c0 = arith.constant 0 : index
    %c0_0 = arith.constant 0 : index
    %c0_1 = arith.constant 0 : index
    %c0_2 = arith.constant 0 : index
    %0 = vector.load %arg3[%c0, %c0_0, %c0_1, %c0_2] : memref<1x18x18x4xbf16, #tpu.memory_space<vmem>>, vector<1x18x18x4xbf16>
    %1 = vector.shape_cast %0 : vector<1x18x18x4xbf16> to vector<18x18x4xbf16>
    %2 = vector.extract_strided_slice %1 {offsets = [0, 0, 0], sizes = [16, 16, 4], strides = [1, 1, 1]} : vector<18x18x4xbf16> to vector<16x16x4xbf16>
    %3 = vector.extract_strided_slice %1 {offsets = [0, 1, 0], sizes = [16, 16, 4], strides = [1, 1, 1]} : vector<18x18x4xbf16> to vector<16x16x4xbf16>
    %4 = vector.extract_strided_slice %1 {offsets = [0, 2, 0], sizes = [16, 16, 4], strides = [1, 1, 1]} : vector<18x18x4xbf16> to vector<16x16x4xbf16>
    %5 = vector.extract_strided_slice %1 {offsets = [1, 0, 0], sizes = [16, 16, 4], strides = [1, 1, 1]} : vector<18x18x4xbf16> to vector<16x16x4xbf16>
    %6 = vector.extract_strided_slice %1 {offsets = [1, 1, 0], sizes = [16, 16, 4], strides = [1, 1, 1]} : vector<18x18x4xbf16> to vector<16x16x4xbf16>
    %7 = vector.extract_strided_slice %1 {offsets = [1, 2, 0], sizes = [16, 16, 4], strides = [1, 1, 1]} : vector<18x18x4xbf16> to vector<16x16x4xbf16>
    %8 = vector.extract_strided_slice %1 {offsets = [2, 0, 0], sizes = [16, 16, 4], strides = [1, 1, 1]} : vector<18x18x4xbf16> to vector<16x16x4xbf16>
    %9 = vector.extract_strided_slice %1 {offsets = [2, 1, 0], sizes = [16, 16, 4], strides = [1, 1, 1]} : vector<18x18x4xbf16> to vector<16x16x4xbf16>
    %10 = vector.extract_strided_slice %1 {offsets = [2, 2, 0], sizes = [16, 16, 4], strides = [1, 1, 1]} : vector<18x18x4xbf16> to vector<16x16x4xbf16>
    %11 = tpu.concatenate %2, %3, %4, %5, %6, %7, %8, %9, %10 in 2 : vector<16x16x4xbf16>, vector<16x16x4xbf16>, vector<16x16x4xbf16>, vector<16x16x4xbf16>, vector<16x16x4xbf16>, vector<16x16x4xbf16>, vector<16x16x4xbf16>, vector<16x16x4xbf16>, vector<16x16x4xbf16> -> vector<16x16x36xbf16>
    %12 = vector.shape_cast %11 : vector<16x16x36xbf16> to vector<256x36xbf16>
    %c0_3 = arith.constant 0 : index
    %c0_4 = arith.constant 0 : index
    %13 = vector.load %arg4[%c0_3, %c0_4] : memref<8x36xbf16, #tpu.memory_space<vmem>>, vector<8x36xbf16>
    %cst = arith.constant dense<0.000000e+00> : vector<8x256xf32>
    %14 = tpu.matmul %13, %12, %cst {dimension_numbers = #tpu.dot_dimension_numbers<[1], [1], [0], [0], [0, 0, 1, 0], [], []>} : vector<8x36xbf16>, vector<256x36xbf16>, vector<8x256xf32> -> vector<8x256xf32>
    %c0_5 = arith.constant 0 : index
    %c0_6 = arith.constant 0 : index
    %15 = vector.load %arg5[%c0_5, %c0_6] : memref<8x1xf32, #tpu.memory_space<vmem>>, vector<8x1xf32>
    %16 = vector.broadcast %15 : vector<8x1xf32> to vector<8x256xf32>
    %17 = arith.addf %14, %16 : vector<8x256xf32>
    %c0_7 = arith.constant 0 : index
    %c0_8 = arith.constant 0 : index
    %c0_9 = arith.constant 0 : index
    %18 = vector.load %arg6[%c0_7, %c0_8, %c0_9] : memref<1x8x256xf32, #tpu.memory_space<vmem>>, vector<1x8x256xf32>
    %19 = vector.shape_cast %18 : vector<1x8x256xf32> to vector<8x256xf32>
    %20 = vector.shape_cast %17 : vector<8x256xf32> to vector<1x8x256xf32>
    tpu.vector_store %arg6[%c0_7, %c0_8, %c0_9], %20 {strides = array<i32>} : memref<1x8x256xf32, #tpu.memory_space<vmem>>, vector<1x8x256xf32>,
    return
  }
  func.func @transform_0(%arg0: i32, %arg1: i32, %arg2: i32) -> (i32, i32, i32, i32) {
    %c0_i32 = arith.constant 0 : i32
    %c0_i32_0 = arith.constant 0 : i32
    %c0_i32_1 = arith.constant 0 : i32
    %c0_i32_2 = arith.constant 0 : i32
    return %arg1, %c0_i32, %c0_i32_0, %c0_i32_1 : i32, i32, i32, i32
  }
  func.func @transform_1(%arg0: i32, %arg1: i32, %arg2: i32) -> (i32, i32) {
    %c0_i32 = arith.constant 0 : i32
    %c0_i32_0 = arith.constant 0 : i32
    return %arg0, %c0_i32 : i32, i32
  }
  func.func @transform_2(%arg0: i32, %arg1: i32, %arg2: i32) -> (i32, i32) {
    %c0_i32 = arith.constant 0 : i32
    %c0_i32_0 = arith.constant 0 : i32
    return %arg0, %c0_i32 : i32, i32
  }
  func.func @transform_3(%arg0: i32, %arg1: i32, %arg2: i32) -> (i32, i32, i32) {
    %c0_i32 = arith.constant 0 : i32
    return %arg1, %arg0, %arg2 : i32, i32, i32
  }
}

</mosaic_0001>

<bundles_post_ra>
// kernel: _forward_impl.1
= control target key start
LH: loop header
LB: loop body
LE: loop exit
PB: predicated region body
PF: predicated region fallthrough
CT: control target
= control target key end

     0   :  { %s1631_s12 = smov 0   ;;  %s1633_s13 = smov 0   ;;  %s2448_s0 = inlined_call_operand.vmem [shape: bf16[2,18,18,4], index: 0, kind: input, shape index: {}]   ;;  %s2449_s1 = inlined_call_operand.vmem [shape: bf16[8,36], index: 1, kind: input, shape index: {}]   ;;  %s2450_s2 = inlined_call_operand.vmem [shape: f32[8,1], index: 2, kind: input, shape index: {}]   ;;  %s2451_s3 = inlined_call_operand.vmem [shape: f32[2,8,256], index: 3, kind: output, shape index: {}]  }
   0x1   :  { %s1635_s14 = smov 0  }
   0x2 LB: > { %s28_s15 = sadd.s32 1, %s1596_s13  ;;  %p1442_p0 = scmp.ge.s32.totalorder %s1600_s14, 1  ;;  %s1600_s14 = sphi %s1635_s14, %s13_s14   ;;  %s1596_s13 = sphi %s1633_s13, %s2497_s13   ;;  %s1592_s12 = sphi %s1631_s12, %s2496_s12  }
   0x3   : > { %p30_p1 = scmp.ge.s32.totalorder %s28_s15, 2  ;;  %p178_p2 = scmp.lt.s32.totalorder %s1600_s14, 3 }
   0x5   : > { %s2499_s15 = smov (%p30_p1, %s28_s15), 0  ;;  %p179_p3 = pnand %p1442_p0, %p178_p2 }
   0x7   : > { %182 = sbr.rel (%p179_p3) target bundleno = 623 (0x26f), region = 32 }
   0xc   : > { %p218_p4 = scmp.lt.s32.totalorder %s1592_s12, 1  ;;  %vm427_vm0 = vsmask.f32 7424  ;;  %s1602_s20 = smov 4   ;;  %vm652_vm1 = vcmask 1046528   ;;  %vm1004_vm2 = vcmask 64512  }
   0xd   : > { %s1603_s21 = smov 8   ;;  %s1604_s22 = smov 12   ;;  %vm971_vm3 = vcmask 31744   ;;  %vm1037_vm4 = vcmask 97280   ;;  %vm1070_vm5 = vcmask 130048   ;;  %vm1103_vm6 = vcmask 162816  }
   0xe   : > { %s2501_s12 = smov (!%p218_p4, %s1592_s12), 1  ;;  %s1605_s23 = smov 16   ;;  %vm1136_vm7 = vcmask 195584   ;;  %vm1169_vm8 = vcmask 228352   ;;  %vm1202_vm9 = vcmask 261120   ;;  %vm1242_vm10 = vcmask 293888  }
   0xf   : > { %s1541_s16 = smul.u32 216, %s2501_s12  ;;  %s1606_s24 = smov 20  }
  0x10   : > { %s1607_s25 = smov 28   ;;  %s1608_s26 = smov 24  }
  0x11   : > { %s1655_s19 = scalar_lea.vmem %s2448_s0, %s1541_s16  ;;  %s1609_s27 = smov 32  }
  0x12   : > { %v1658_v0 = vld [vmem:[%s1655_s19 + $0x30] sm:$0xff]  ;;  %v259_v1 = vld [vmem:[%s1655_s19 + $0x38] sm:$0x1]  ;;  %v253_v4 = vld [vmem:[%s1655_s19 + $0x20] sm:$0x1]  ;;  %s1522_s5 = sshll.u32 %s2501_s12, 4 }
  0x13   : > { %2472 = vst [vmem:[#allocation2_spill] sm:$0xff] %v1658_v0  ;;  %v1662_v2 = vld [vmem:[%s1655_s19 + $0x18] sm:$0xff]  ;;  %v399_v3 = vunpack.c.l.b16 %v259_v1  ;;  %v1666_v5 = vld [vmem:[%s1655_s19] sm:$0xff]  ;;  %v247_v6 = vld [vmem:[%s1655_s19 + $0x8] sm:$0x1]  ;;  %v477_v7 = vshrl.u32 %v1658_v0, 16  ;;  %v397_v9 = vunpack.c.l.b16 %v253_v4  ;;  %s243_s8 = scalar_lea.vmem %s2451_s3, %s1522_s5 }
  0x14   : > { %v479_v8 = vshll.u32 %v1658_v0, 16  ;;  %v453_v10 = vshrl.u32 %v1662_v2, 16  ;;  %v262_v11 = vld [vmem:[%s1655_s19 + $0x44] sm:$0x1]  ;;  %v455_v13 = vshll.u32 %v1662_v2, 16  ;;  %v395_v14 = vunpack.c.l.b16 %v247_v6  ;;  %v1678_v16 = vld [vmem:[%s1655_s19 + $0x3c] sm:$0xff] }
  0x15   : > { %v1673_v12 = vpack.c.b16 %v399_v3, %v399_v3  ;;  %v429_v15 = vshrl.u32 %v1666_v5, 16  ;;  %v1680_v18 = vpack.c.b16 %v397_v9, %v397_v9  ;;  %v431_v19 = vshll.u32 %v1666_v5, 16  ;;  %v256_v25 = vld [vmem:[%s1655_s19 + $0x2c] sm:$0x1]  ;;  %v1692_v30 = vld [vmem:[%s1655_s19 + $0x24] sm:$0xff]  ;;  %v1725_v59 = vld [vmem:[%s1655_s19 + $0x54] sm:$0xff] }
  0x16   : > { %v481_v17 = vrot.slane %v479_v8, 1  ;;  %v400_v20 = vunpack.c.l.b16 %v262_v11  ;;  %v457_v22 = vrot.slane %v455_v13, 1  ;;  %v1684_v23 = vpack.c.b16 %v395_v14, %v395_v14  ;;  %v1698_v39 = vld [vmem:[%s1655_s19 + $0xc] sm:$0xff]  ;;  %v250_v40 = vld [vmem:[%s1655_s19 + $0x14] sm:$0x1]  ;;  %v1706_v45 = vld [vmem:[%s1655_s19 + $0x60] sm:$0xff] }
  0x17   : > { %v484_v21 = vshll.u32 %v1673_v12, 16  ;;  %v489_v24 = vshrl.u32 %v1678_v16, 16  ;;  %v460_v27 = vshll.u32 %v1680_v18, 16  ;;  %v433_v28 = vrot.slane %v431_v19, 1  ;;  %v271_v46 = vld [vmem:[%s1655_s19 + $0x68] sm:$0x1] }
  0x18   : > { %v482_v26 = vor.u32 %v481_v17, %v477_v7  ;;  %v1689_v29 = vpack.c.b16 %v400_v20, %v400_v20  ;;  %v458_v32 = vor.u32 %v457_v22, %v453_v10  ;;  %v436_v33 = vshll.u32 %v1684_v23, 16  ;;  %v268_v60 = vld [vmem:[%s1655_s19 + $0x5c] sm:$0x1]  ;;  %v1738_v8 = vld [vmem:[%s1655_s19 + $0x48] sm:$0xff]  ;;  %v265_v9 = vld [vmem:[%s1655_s19 + $0x50] sm:$0x1] }
  0x19   : > { %v486_v31 = vrot.slane %v484_v21, 1  ;;  %v491_v34 = vshll.u32 %v1678_v16, 16  ;;  %v462_v35 = vrot.slane %v460_v27, 1  ;;  %v434_v36 = vor.u32 %v433_v28, %v429_v15  ;;  %v280_v21 = vld [vmem:[%s1655_s19 + $0x8c] sm:$0x1]  ;;  %v1752_v27 = vld [vmem:[%s1655_s19 + $0x84] sm:$0xff] }
  0x1a   : > { %v496_v37 = vshll.u32 %v1689_v29, 16  ;;  %v398_v38 = vunpack.c.l.b16 %v256_v25  ;;  %v438_v42 = vrot.slane %v436_v33, 1  ;;  %v465_v44 = vshrl.u32 %v1692_v30, 16 }
  0x1b   : > { %v1702_v41 = vsel %vm427_vm0, %v482_v26, %v486_v31  ;;  %v493_v43 = vrot.slane %v491_v34, 1  ;;  %v1712_v47 = vsel %vm427_vm0, %v458_v32, %v462_v35  ;;  %v467_v50 = vshll.u32 %v1692_v30, 16  ;;  %v1759_v34 = vld [vmem:[%s1655_s19 + $0x78] sm:$0xff] }
  0x1c   : > { %628 = vrot.lane.b32.xlu2 %v1702_v41, %s1602_s20  ;;  %2473 = vst [vmem:[#allocation3_spill] sm:$0xff] %v1712_v47  ;;  %v498_v48 = vrot.slane %v496_v37, 1  ;;  %v1714_v49 = vpack.c.b16 %v398_v38, %v398_v38  ;;  %624 = vrot.lane.b32.xlu1 %v1712_v47, %s1602_s20  ;;  %v439_v51 = vsel %vm427_vm0, %v434_v36, %v438_v42  ;;  %v396_v53 = vunpack.c.l.b16 %v250_v40  ;;  %v277_v40 = vld [vmem:[%s1655_s19 + $0x80] sm:$0x1] }
  0x1d   : > { %v494_v52 = vor.u32 %v493_v43, %v489_v24  ;;  %v441_v54 = vshrl.u32 %v1698_v39, 16  ;;  %620 = vrot.lane.b32.xlu0 %v439_v51, %s1602_s20  ;;  %v469_v55 = vrot.slane %v467_v50, 1  ;;  %v443_v57 = vshll.u32 %v1698_v39, 16 }
  0x1e   : > { %v472_v56 = vshll.u32 %v1714_v49, 16  ;;  %v403_v58 = vunpack.c.l.b16 %v271_v46  ;;  %v1731_v62 = vpack.c.b16 %v396_v53, %v396_v53  ;;  %v525_v63 = vshrl.u32 %v1706_v45, 16  ;;  %v274_v53 = vld [vmem:[%s1655_s19 + $0x74] sm:$0x1] }
  0x1f   : > { %v1729_v61 = vsel %vm427_vm0, %v494_v52, %v498_v48  ;;  %v527_v1 = vshll.u32 %v1706_v45, 16  ;;  %v470_v3 = vor.u32 %v469_v55, %v465_v44  ;;  %v445_v6 = vrot.slane %v443_v57, 1  ;;  %v1778_v52 = vld [vmem:[%s1655_s19 + $0x6c] sm:$0xff] }
  0x20   : > { %v474_v4 = vrot.slane %v472_v56, 1  ;;  %v1735_v7 = vpack.c.b16 %v403_v58, %v403_v58  ;;  %v448_v10 = vshll.u32 %v1731_v62, 16  ;;  %v402_v13 = vunpack.c.l.b16 %v268_v60  ;;  %v1786_v58 = vld [vmem:[%s1655_s19 + $0xa8] sm:$0xff] }
  0x21   : > { %v529_v11 = vrot.slane %v527_v1, 1  ;;  %v513_v14 = vshrl.u32 %v1725_v59, 16  ;;  %v446_v17 = vor.u32 %v445_v6, %v441_v54  ;;  %v515_v20 = vshll.u32 %v1725_v59, 16 }
  0x22   : > { %v1744_v15 = vsel %vm427_vm0, %v470_v3, %v474_v4  ;;  %v532_v19 = vshll.u32 %v1735_v7, 16  ;;  %v450_v22 = vrot.slane %v448_v10, 1  ;;  %v1749_v25 = vpack.c.b16 %v402_v13, %v402_v13  ;;  %v289_v4 = vld [vmem:[%s1655_s19 + $0xb0] sm:$0x1] }
  0x23   : > { %2474 = vst [vmem:[#allocation4_spill] sm:$0xff] %v1744_v15  ;;  %v530_v24 = vor.u32 %v529_v11, %v525_v63  ;;  %v401_v26 = vunpack.c.l.b16 %v265_v9  ;;  %v517_v31 = vrot.slane %v515_v20, 1  ;;  %v501_v32 = vshrl.u32 %v1738_v8, 16  ;;  %v1802_v20 = vld [vmem:[%s1655_s19 + $0x9c] sm:$0xff] }
  0x24   : > { %630 = vrot.lane.b32.xlu2 %v1729_v61, %s1602_s20  ;;  %v534_v28 = vrot.slane %v532_v19, 1  ;;  %v503_v33 = vshll.u32 %v1738_v8, 16  ;;  %626 = vrot.lane.b32.xlu1 %v1744_v15, %s1602_s20  ;;  %v1764_v35 = vsel %vm427_vm0, %v446_v17, %v450_v22  ;;  %v520_v36 = vshll.u32 %v1749_v25, 16 }
  0x25   : > { %v1767_v37 = vpack.c.b16 %v401_v26, %v401_v26  ;;  %v406_v38 = vunpack.c.l.b16 %v280_v21  ;;  %622 = vrot.lane.b32.xlu0 %v1764_v35, %s1602_s20  ;;  %v518_v42 = vor.u32 %v517_v31, %v513_v14  ;;  %v561_v44 = vshrl.u32 %v1752_v27, 16  ;;  %v286_v21 = vld [vmem:[%s1655_s19 + $0xa4] sm:$0x1] }
  0x26   : > { %v505_v43 = vrot.slane %v503_v33, 1  ;;  %v522_v46 = vrot.slane %v520_v36, 1  ;;  %v563_v51 = vshll.u32 %v1752_v27, 16  ;;  %v1782_v54 = vsel %vm427_vm0, %v530_v24, %v534_v28 }
  0x27   : > { %v508_v48 = vshll.u32 %v1767_v37, 16  ;;  %v1774_v50 = vpack.c.b16 %v406_v38, %v406_v38  ;;  %v405_v56 = vunpack.c.l.b16 %v277_v40  ;;  %v551_v57 = vshll.u32 %v1759_v34, 16 }
  0x28   : > { %v506_v55 = vor.u32 %v505_v43, %v501_v32  ;;  %v565_v63 = vrot.slane %v563_v51, 1  ;;  %v549_v3 = vshrl.u32 %v1759_v34, 16  ;;  %v1792_v6 = vsel %vm427_vm0, %v518_v42, %v522_v46  ;;  %v1819_v43 = vld [vmem:[%s1655_s19 + $0x90] sm:$0xff] }
  0x29   : > { %v510_v60 = vrot.slane %v508_v48, 1  ;;  %v568_v1 = vshll.u32 %v1774_v50, 16  ;;  %v1794_v9 = vpack.c.b16 %v405_v56, %v405_v56  ;;  %v553_v10 = vrot.slane %v551_v57, 1 }
  0x2a   : > { %v404_v11 = vunpack.c.l.b16 %v274_v53  ;;  %v566_v14 = vor.u32 %v565_v63, %v561_v44  ;;  %v537_v17 = vshrl.u32 %v1778_v52, 16  ;;  %v539_v19 = vshll.u32 %v1778_v52, 16  ;;  %v283_v44 = vld [vmem:[%s1655_s19 + $0x98] sm:$0x1] }
  0x2b   : > { %v1797_v13 = vsel %vm427_vm0, %v506_v55, %v510_v60  ;;  %v570_v22 = vrot.slane %v568_v1, 1  ;;  %v556_v24 = vshll.u32 %v1794_v9, 16  ;;  %v409_v28 = vunpack.c.l.b16 %v289_v4 }
  0x2c   : > { %636 = vrot.lane.b32.xlu2 %v1782_v54, %s1602_s20  ;;  %v1808_v26 = vpack.c.b16 %v404_v11, %v404_v11  ;;  %634 = vrot.lane.b32.xlu1 %v1792_v6, %s1602_s20  ;;  %v554_v31 = vor.u32 %v553_v10, %v549_v3  ;;  %v541_v32 = vrot.slane %v539_v19, 1  ;;  %v599_v33 = vshll.u32 %v1786_v58, 16 }
  0x2d   : > { %632 = vrot.lane.b32.xlu0 %v1797_v13, %s1602_s20  ;;  %v558_v36 = vrot.slane %v556_v24, 1  ;;  %v1816_v40 = vpack.c.b16 %v409_v28, %v409_v28  ;;  %v408_v42 = vunpack.c.l.b16 %v286_v21  ;;  %v587_v48 = vshll.u32 %v1802_v20, 16 }
  0x2e   : > { %v544_v38 = vshll.u32 %v1808_v26, 16  ;;  %v542_v46 = vor.u32 %v541_v32, %v537_v17  ;;  %v1824_v51 = vsel %vm427_vm0, %v566_v14, %v570_v22  ;;  %v597_v55 = vshrl.u32 %v1786_v58, 16  ;;  %v292_v14 = vld [vmem:[%s1655_s19 + $0xbc] sm:$0x1]  ;;  %v1844_v22 = vld [vmem:[%s1655_s19 + $0xb4] sm:$0xff] }
  0x2f   : > { %2475 = vst [vmem:[#allocation5_spill] sm:$0xff] %v1824_v51  ;;  %v1827_v56 = vpack.c.b16 %v408_v42, %v408_v42  ;;  %v601_v57 = vrot.slane %v599_v33, 1  ;;  %v604_v60 = vshll.u32 %v1816_v40, 16  ;;  %v585_v63 = vshrl.u32 %v1802_v20, 16 }
  0x30   : > { %v546_v53 = vrot.slane %v544_v38, 1  ;;  %v407_v1 = vunpack.c.l.b16 %v283_v44  ;;  %v1832_v3 = vsel %vm427_vm0, %v554_v31, %v558_v36  ;;  %v589_v4 = vrot.slane %v587_v48, 1 }
  0x31   : > { %2476 = vst [vmem:[#allocation6_spill] sm:$0xff] %v1832_v3  ;;  %v592_v10 = vshll.u32 %v1827_v56, 16  ;;  %v575_v11 = vshll.u32 %v1819_v43, 16  ;;  %v573_v21 = vshrl.u32 %v1819_v43, 16  ;;  %v602_v28 = vor.u32 %v601_v57, %v597_v55 }
  0x32   : > { %v1838_v17 = vsel %vm427_vm0, %v542_v46, %v546_v53  ;;  %v1840_v19 = vpack.c.b16 %v407_v1, %v407_v1  ;;  %v606_v31 = vrot.slane %v604_v60, 1  ;;  %v410_v33 = vunpack.c.l.b16 %v292_v14 }
  0x33   : > { %2477 = vst [vmem:[#allocation7_spill] sm:$0xff] %v1838_v17  ;;  %v577_v24 = vrot.slane %v575_v11, 1  ;;  %v590_v36 = vor.u32 %v589_v4, %v585_v63  ;;  %v594_v38 = vrot.slane %v592_v10, 1  ;;  %v611_v48 = vshll.u32 %v1844_v22, 16 }
  0x34   : > { %642 = vrot.lane.b32.xlu2 %v1824_v51, %s1602_s20  ;;  %640 = vrot.lane.b32.xlu1 %v1832_v3, %s1602_s20  ;;  %v580_v32 = vshll.u32 %v1840_v19, 16  ;;  %v1853_v46 = vpack.c.b16 %v410_v33, %v410_v33  ;;  %v1857_v53 = vsel %vm427_vm0, %v602_v28, %v606_v31  ;;  %v609_v60 = vshrl.u32 %v1844_v22, 16 }
  0x35   : > { %638 = vrot.lane.b32.xlu0 %v1838_v17, %s1602_s20  ;;  %v578_v42 = vor.u32 %v577_v24, %v573_v21  ;;  %v1860_v55 = vsel %vm427_vm0, %v590_v36, %v594_v38  ;;  %v613_v1 = vrot.slane %v611_v48, 1  ;;  %v656_v4 = vrot.slane %v1698_v39, 1 }
  0x36   : > { %v582_v44 = vrot.slane %v580_v32, 1  ;;  %v616_v63 = vshll.u32 %v1853_v46, 16  ;;  %v657_v10 = vrot.slane %v1731_v62, 1  ;;  %v653_v11 = vrot.slane %v1666_v5, 1 }
  0x37   : > { %v654_v14 = vrot.slane %v1684_v23, 1  ;;  %v614_v21 = vor.u32 %v613_v1, %v609_v60  ;;  %v665_v62 = vrot.slane %v1658_v0, 1  ;;  %v666_v23 = vrot.slane %v1673_v12, 1 }
  0x38   : > { %v1863_v57 = vsel %vm427_vm0, %v578_v42, %v582_v44  ;;  %v618_v24 = vrot.slane %v616_v63, 1  ;;  %v1878_v28 = vsel %vm652_vm1, %v656_v4, %v657_v10  ;;  %v662_v33 = vrot.slane %v1692_v30, 1 }
  0x39   : > { %2478 = vst [vmem:[#allocation8_spill] sm:$0xff] %v1878_v28  ;;  %v655_v31 = vsel %vm652_vm1, %v653_v11, %v654_v14  ;;  %v663_v36 = vrot.slane %v1714_v49, 1  ;;  %v659_v38 = vrot.slane %v1662_v2, 1  ;;  %v660_v42 = vrot.slane %v1680_v18, 1 }
  0x3a   : > { %v1882_v32 = vsel %vm427_vm0, %v614_v21, %v618_v24  ;;  %v1896_v44 = vsel %vm652_vm1, %v665_v62, %v666_v23  ;;  %v674_v12 = vrot.slane %v1725_v59, 1  ;;  %v675_v49 = vrot.slane %v1749_v25, 1 }
  0x3b   : > { %v1899_v48 = vsel %vm652_vm1, %v662_v33, %v663_v36  ;;  %v1902_v60 = vsel %vm652_vm1, %v659_v38, %v660_v42  ;;  %v671_v18 = vrot.slane %v1738_v8, 1  ;;  %v672_v1 = vrot.slane %v1767_v37, 1 }
  0x3c   : > { %648 = vrot.lane.b32.xlu2 %v1857_v53, %s1602_s20  ;;  %646 = vrot.lane.b32.xlu1 %v1860_v55, %s1602_s20  ;;  %2479 = vst [vmem:[#allocation9_spill] sm:$0xff] %v1899_v48  ;;  %v668_v63 = vrot.slane %v1678_v16, 1  ;;  %v669_v4 = vrot.slane %v1689_v29, 1  ;;  %v1917_v10 = vsel %vm652_vm1, %v674_v12, %v675_v49  ;;  %v683_v25 = vrot.slane %v1759_v34, 1 }
  0x3d   : > { %644 = vrot.lane.b32.xlu0 %v1863_v57, %s1602_s20  ;;  %2480 = vst [vmem:[#allocation10_spill] sm:$0xff] %v1902_v60  ;;  %v1920_v11 = vsel %vm652_vm1, %v671_v18, %v672_v1  ;;  %v684_v37 = vrot.slane %v1794_v9, 1  ;;  %v680_v29 = vrot.slane %v1778_v52, 1  ;;  %v681_v21 = vrot.slane %v1808_v26, 1 }
  0x3e   : > { %v1923_v14 = vsel %vm652_vm1, %v668_v63, %v669_v4  ;;  %v677_v24 = vrot.slane %v1706_v45, 1  ;;  %v692_v9 = vrot.slane %v1802_v20, 1  ;;  %v693_v26 = vrot.slane %v1827_v56, 1 }
  0x3f   : > { %v1938_v62 = vsel %vm652_vm1, %v683_v25, %v684_v37  ;;  %v1941_v23 = vsel %vm652_vm1, %v680_v29, %v681_v21  ;;  %v690_v36 = vrot.slane %v1840_v19, 1  ;;  %v686_v38 = vrot.slane %v1752_v27, 1 }
  0x40   : > { %2481 = vst [vmem:[#allocation11_spill] sm:$0xff] %v1938_v62  ;;  %v687_v42 = vrot.slane %v1774_v50, 1  ;;  %v1959_v12 = vsel %vm652_vm1, %v692_v9, %v693_v26  ;;  %v698_v50 = vrot.slane %v1844_v22, 1  ;;  %v699_v56 = vrot.slane %v1853_v46, 1 }
  0x41   : > { %v695_v19 = vrot.slane %v1786_v58, 1  ;;  %v696_v1 = vrot.slane %v1816_v40, 1 }
  0x42   : > { %v1965_v18 = vsel %vm652_vm1, %v686_v38, %v687_v42  ;;  %v1978_v63 = vsel %vm652_vm1, %v698_v50, %v699_v56 }
  0x43   : > { %2483 = vst [vmem:[#allocation13_spill] sm:$0xff] %v1965_v18  ;;  %v1981_v4 = vsel %vm652_vm1, %v695_v19, %v696_v1 }
  0x44   : > { %703 = vrot.lane.b32.xlu2 %v1878_v28, %s1603_s21  ;;  %701 = vrot.lane.b32.xlu1 %v655_v31, %s1603_s21  ;;  %v678_v31 = vrot.slane %v1735_v7, 1  ;;  %v689_v7 = vrot.slane %v1819_v43, 1 }
  0x45   : > { %650 = vrot.lane.b32.xlu0 %v1882_v32, %s1602_s20 }
  0x46   : > { %v1944_v33 = vsel %vm652_vm1, %v677_v24, %v678_v31  ;;  %v1962_v49 = vsel %vm652_vm1, %v689_v7, %v690_v36  ;;  %v2011_v24 = vld [vmem:[%s1655_s19 + $0xc0] sm:$0xff]  ;;  %v295_v31 = vld [vmem:[%s1655_s19 + $0xc8] sm:$0x1] }
  0x47   : > { %2482 = vst [vmem:[#allocation12_spill] sm:$0xff] %v1962_v49  ;;  %v771_v9 = vunpack.c.l.b16 %v295_v31  ;;  %v776_v38 = vshll.u32 %v2011_v24, 16  ;;  %v774_v50 = vshrl.u32 %v2011_v24, 16  ;;  %v817_v1 = vrot.slane %v2011_v24, 1 }
  0x49   : > { %v772_v36 = vpack.c.b16 %v771_v9, %v771_v9  ;;  %v778_v56 = vrot.slane %v776_v38, 1 }
  0x4b   : > { %v781_v19 = vshll.u32 %v772_v36, 16  ;;  %v818_v31 = vrot.slane %v772_v36, 1 }
  0x4c   : > { %709 = vrot.lane.b32.xlu2 %v1896_v44, %s1603_s21  ;;  %707 = vrot.lane.b32.xlu1 %v1899_v48, %s1603_s21 }
  0x4d   : > { %705 = vrot.lane.b32.xlu0 %v1902_v60, %s1603_s21  ;;  %v783_v3 = vrot.slane %v781_v19, 1 }
  0x54   : > { %715 = vrot.lane.b32.xlu2 %v1917_v10, %s1603_s21  ;;  %713 = vrot.lane.b32.xlu1 %v1920_v11, %s1603_s21 }
  0x55   : > { %711 = vrot.lane.b32.xlu0 %v1923_v14, %s1603_s21 }
  0x5c   : > { %721 = vrot.lane.b32.xlu2 %v1938_v62, %s1603_s21  ;;  %719 = vrot.lane.b32.xlu1 %v1941_v23, %s1603_s21  ;;  %v779_v62 = vor.u32 %v778_v56, %v774_v50 }
  0x5d   : > { %717 = vrot.lane.b32.xlu0 %v1944_v33, %s1603_s21 }
  0x5e   : > { %v2042_v36 = vsel %vm427_vm0, %v779_v62, %v783_v3 }
  0x64   : > { %727 = vrot.lane.b32.xlu2 %v1959_v12, %s1603_s21  ;;  %725 = vrot.lane.b32.xlu1 %v1962_v49, %s1603_s21 }
  0x65   : > { %723 = vrot.lane.b32.xlu0 %v1965_v18, %s1603_s21  ;;  %v298_v18 = vld [vmem:[%s1655_s19 + $0xd4] sm:$0x1] }
  0x6c   : > { %738 = vrot.lane.b32.xlu2 %v1698_v39, %s1604_s22  ;;  %731 = vrot.lane.b32.xlu1 %v1978_v63, %s1603_s21 }
  0x6d   : > { %729 = vrot.lane.b32.xlu0 %v1981_v4, %s1603_s21 }
  0x74   : > { %744 = vrot.lane.b32.xlu2 %v1658_v0, %s1604_s22  ;;  %742 = vrot.lane.b32.xlu1 %v1692_v30, %s1604_s22 }
  0x75   : > { %740 = vrot.lane.b32.xlu0 %v1662_v2, %s1604_s22 }
  0x76   : > { %v629_v40 = vpop.permute.xlu2 %628 }
  0x7c   : > { %750 = vrot.lane.b32.xlu2 %v1725_v59, %s1604_s22  ;;  %748 = vrot.lane.b32.xlu1 %v1738_v8, %s1604_s22 }
  0x7d   : > { %746 = vrot.lane.b32.xlu0 %v1678_v16, %s1604_s22 }
  0x7e   : > { %v1994_v46 = vpop.permute.xlu2 %630 }
  0x84   : > { %756 = vrot.lane.b32.xlu2 %v1759_v34, %s1604_s22  ;;  %754 = vrot.lane.b32.xlu1 %v1778_v52, %s1604_s22 }
  0x85   : > { %752 = vrot.lane.b32.xlu0 %v1706_v45, %s1604_s22 }
  0x86   : > { %v1999_v25 = vpop.permute.xlu2 %636 }
  0x8c   : > { %762 = vrot.lane.b32.xlu2 %v1802_v20, %s1604_s22  ;;  %760 = vrot.lane.b32.xlu1 %v1819_v43, %s1604_s22 }
  0x8d   : > { %758 = vrot.lane.b32.xlu0 %v1752_v27, %s1604_s22 }
  0x8e   : > { %v2004_v37 = vpop.permute.xlu2 %642  ;;  %v2006_v29 = vpop.permute.xlu1 %624 }
  0x8f   : > { %v2008_v21 = vpop.permute.xlu0 %620 }
  0x94   : > { %768 = vrot.lane.b32.xlu2 %v2011_v24, %s1604_s22  ;;  %766 = vrot.lane.b32.xlu1 %v1844_v22, %s1604_s22 }
  0x95   : > { %764 = vrot.lane.b32.xlu0 %v1786_v58, %s1604_s22 }
  0x96   : > { %v2017_v26 = vpop.permute.xlu2 %648  ;;  %v2019_v7 = vpop.permute.xlu1 %626 }
  0x97   : > { %v623_v42 = vpop.permute.xlu0 %622 }
  0x98   : > { %v975_v9 = vsel %vm971_vm3, %v1698_v39, %v623_v42  ;;  %v1540_v39 = vld [vmem:[%s1655_s19 + $0xcc] sm:$0xff]  ;;  %v890_v42 = vunpack.c.l.b16 %v298_v18 }
  0x99   : > { %v895_v18 = vshll.u32 %v1540_v39, 16 }
  0x9a   : > { %v891_v62 = vpack.c.b16 %v890_v42, %v890_v42 }
  0x9c   : > { %799 = vrot.lane.b32.xlu2 %v1782_v54, %s1605_s23  ;;  %787 = vrot.lane.b32.xlu1 %v1712_v47, %s1605_s23  ;;  %v2039_v47 = vsel %vm652_vm1, %v817_v1, %v818_v31  ;;  %v893_v1 = vshrl.u32 %v1540_v39, 16  ;;  %v897_v31 = vrot.slane %v895_v18, 1 }
  0x9d   : > { %785 = vrot.lane.b32.xlu0 %v1764_v35, %s1605_s23  ;;  %v981_v35 = vsel %vm971_vm3, %v1658_v0, %v629_v40  ;;  %v936_v40 = vrot.slane %v1540_v39, 1 }
  0x9e   : > { %v704_v38 = vpop.permute.xlu2 %703  ;;  %v635_v28 = vpop.permute.xlu1 %634  ;;  %v898_v18 = vor.u32 %v897_v31, %v893_v1 }
  0x9f   : > { %v2033_v60 = vsel %vm1004_vm2, %v975_v9, %v704_v38  ;;  %v2035_v48 = vpop.permute.xlu0 %632  ;;  %v900_v9 = vshll.u32 %v891_v62, 16  ;;  %v937_v38 = vrot.slane %v891_v62, 1  ;;  %v987_v0 = vsel %vm971_vm3, %v1725_v59, %v635_v28 }
  0xa1   : > { %v902_v15 = vrot.slane %v900_v9, 1  ;;  %v977_v9 = vsel %vm971_vm3, %v1662_v2, %v2006_v29  ;;  %v985_v2 = vsel %vm971_vm3, %v1738_v8, %v2035_v48 }
  0xa3   : > { %v903_v49 = vsel %vm427_vm0, %v898_v18, %v902_v15 }
  0xa4   : > { %850 = vrot.lane.b32.xlu2 %v2039_v47, %s1606_s24  ;;  %834 = vrot.lane.b32.xlu1 %v1944_v33, %s1606_s24 }
  0xa5   : > { %815 = vrot.lane.b32.xlu0 %v2042_v36, %s1605_s23 }
  0xa6   : > { %v710_v50 = vpop.permute.xlu2 %709  ;;  %v641_v56 = vpop.permute.xlu1 %640 }
  0xa7   : > { %v2054_v3 = vsel %vm1004_vm2, %v981_v35, %v710_v50  ;;  %v639_v19 = vpop.permute.xlu0 %638  ;;  %v993_v28 = vsel %vm971_vm3, %v1759_v34, %v641_v56 }
  0xac   : > { %918 = vrot.lane.b32.xlu2 %v1838_v17, %s1607_s25  ;;  %887 = vrot.lane.b32.xlu1 %v1540_v39, %s1608_s26  ;;  %v938_v17 = vsel %vm652_vm1, %v936_v40, %v937_v38  ;;  %v973_v39 = vsel %vm971_vm3, %v1666_v5, %v2008_v21  ;;  %v979_v21 = vsel %vm971_vm3, %v1692_v30, %v2019_v7 }
  0xad   : > { %871 = vrot.lane.b32.xlu0 %v1778_v52, %s1608_s26 }
  0xae   : > { %v716_v42 = vpop.permute.xlu2 %715  ;;  %v647_v35 = vpop.permute.xlu1 %646 }
  0xaf   : > { %v2064_v50 = vsel %vm1004_vm2, %v987_v0, %v716_v42  ;;  %v645_v51 = vpop.permute.xlu0 %644 }
  0xb4   : > { %969 = vrot.lane.b32.xlu2 %v938_v17, %s1609_s27  ;;  %953 = vrot.lane.b32.xlu1 %v1941_v23, %s1609_s27 }
  0xb5   : > { %934 = vrot.lane.b32.xlu0 %v903_v49, %s1607_s25  ;;  %v999_v49 = vsel %vm971_vm3, %v1802_v20, %v647_v35 }
  0xb6   : > { %v722_v0 = vpop.permute.xlu2 %721  ;;  %v702_v15 = vpop.permute.xlu1 %701 }
  0xb7   : > { %v2078_v62 = vsel %vm1004_vm2, %v993_v28, %v722_v0  ;;  %v1006_v1 = vsel %vm1004_vm2, %v973_v39, %v702_v15  ;;  %v651_v17 = vpop.permute.xlu0 %650  ;;  %v991_v39 = vsel %vm971_vm3, %v1778_v52, %v639_v19  ;;  %v995_v19 = vsel %vm971_vm3, %v1752_v27, %v2004_v37 }
  0xbc   : > { %832 = vrot.lane.b32.xlu2 %v1917_v10, %s1606_s24  ;;  %813 = vrot.lane.b32.xlu1 %v1882_v32, %s1605_s23 }
  0xbd   : > { %797 = vrot.lane.b32.xlu0 %v1792_v6, %s1605_s23 }
  0xbe   : > { %v728_v5 = vpop.permute.xlu2 %727  ;;  %v708_v31 = vpop.permute.xlu1 %707 }
  0xbf   : > { %v2093_v56 = vsel %vm1004_vm2, %v999_v49, %v728_v5  ;;  %v1012_v40 = vsel %vm1004_vm2, %v979_v21, %v708_v31  ;;  %v706_v38 = vpop.permute.xlu0 %705 }
  0xc0   : > { %v1010_v42 = vsel %vm1004_vm2, %v977_v9, %v706_v38 }
  0xc4   : > { %885 = vrot.lane.b32.xlu2 %v2011_v24, %s1608_s26  ;;  %869 = vrot.lane.b32.xlu1 %v1706_v45, %s1608_s26  ;;  %v983_v24 = vsel %vm971_vm3, %v1678_v16, %v1994_v46 }
  0xc5   : > { %848 = vrot.lane.b32.xlu0 %v1978_v63, %s1606_s24 }
  0xc6   : > { %v739_v7 = vpop.permute.xlu2 %738  ;;  %v714_v35 = vpop.permute.xlu1 %713 }
  0xc7   : > { %v2110_v29 = vsel %vm1037_vm4, %v1006_v1, %v739_v7  ;;  %v1018_v18 = vsel %vm1004_vm2, %v985_v2, %v714_v35  ;;  %v712_v28 = vpop.permute.xlu0 %711  ;;  %v989_v1 = vsel %vm971_vm3, %v1706_v45, %v1999_v25 }
  0xc8   : > { %v1016_v0 = vsel %vm1004_vm2, %v983_v24, %v712_v28 }
  0xcc   : > { %951 = vrot.lane.b32.xlu2 %v1944_v33, %s1609_s27  ;;  %932 = vrot.lane.b32.xlu1 %v2042_v36, %s1607_s25 }
  0xcd   : > { %916 = vrot.lane.b32.xlu0 %v1782_v54, %s1607_s25  ;;  %v997_v54 = vsel %vm971_vm3, %v1819_v43, %v645_v51  ;;  %v1003_v51 = vsel %vm971_vm3, %v1844_v22, %v651_v17 }
  0xce   : > { %v745_v48 = vpop.permute.xlu2 %744  ;;  %v720_v15 = vpop.permute.xlu1 %719 }
  0xcf   : > { %v2126_v46 = vsel %vm1037_vm4, %v1012_v40, %v745_v48  ;;  %v1024_v33 = vsel %vm1004_vm2, %v991_v39, %v720_v15  ;;  %v718_v49 = vpop.permute.xlu0 %717  ;;  %v1001_v40 = vsel %vm971_vm3, %v1786_v58, %v2017_v26 }
  0xd0   : > { %v1022_v36 = vsel %vm1004_vm2, %v989_v1, %v718_v49  ;;  %v2484_v49 = vld [vmem:[#allocation12_spill] sm:$0xff] }
  0xd4   : > { %811 = vrot.lane.b32.xlu2 %v1857_v53, %s1605_s23  ;;  %795 = vrot.lane.b32.xlu1 %v1797_v13, %s1605_s23 }
  0xd5   : > { %967 = vrot.lane.b32.xlu0 %v2039_v47, %s1609_s27 }
  0xd6   : > { %v751_v52 = vpop.permute.xlu2 %750  ;;  %v726_v25 = vpop.permute.xlu1 %725 }
  0xd7   : > { %v2142_v45 = vsel %vm1037_vm4, %v1018_v18, %v751_v52  ;;  %v1030_v5 = vsel %vm1004_vm2, %v997_v54, %v726_v25  ;;  %v724_v21 = vpop.permute.xlu0 %723 }
  0xd8   : > { %v1028_v31 = vsel %vm1004_vm2, %v995_v19, %v724_v21 }
  0xdc   : > { %867 = vrot.lane.b32.xlu2 %v1725_v59, %s1608_s26  ;;  %846 = vrot.lane.b32.xlu1 %v1981_v4, %s1606_s24 }
  0xdd   : > { %830 = vrot.lane.b32.xlu0 %v1920_v11, %s1606_s24 }
  0xde   : > { %v757_v47 = vpop.permute.xlu2 %756  ;;  %v732_v9 = vpop.permute.xlu1 %731 }
  0xdf   : > { %v2158_v37 = vsel %vm1037_vm4, %v1024_v33, %v757_v47  ;;  %v2164_v59 = vsel %vm1004_vm2, %v1003_v51, %v732_v9  ;;  %v730_v38 = vpop.permute.xlu0 %729 }
  0xe0   : > { %v2167_v7 = vsel %vm1004_vm2, %v1001_v40, %v730_v38 }
  0xe4   : > { %930 = vrot.lane.b32.xlu2 %v1882_v32, %s1607_s25  ;;  %914 = vrot.lane.b32.xlu1 %v1792_v6, %s1607_s25 }
  0xe5   : > { %883 = vrot.lane.b32.xlu0 %v1844_v22, %s1608_s26 }
  0xe6   : > { %v763_v17 = vpop.permute.xlu2 %762  ;;  %v743_v26 = vpop.permute.xlu1 %742 }
  0xe7   : > { %v2176_v2 = vsel %vm1037_vm4, %v1030_v5, %v763_v17  ;;  %v2179_v35 = vsel %vm1037_vm4, %v1010_v42, %v743_v26  ;;  %v741_v24 = vpop.permute.xlu0 %740 }
  0xe8   : > { %v1041_v18 = vsel %vm1037_vm4, %v2033_v60, %v741_v24 }
  0xec   : > { %793 = vrot.lane.b32.xlu2 %v1729_v61, %s1605_s23  ;;  %965 = vrot.lane.b32.xlu1 %v1978_v63, %s1609_s27 }
  0xed   : > { %949 = vrot.lane.b32.xlu0 %v1917_v10, %s1609_s27 }
  0xee   : > { %v769_v6 = vpop.permute.xlu2 %768  ;;  %v749_v22 = vpop.permute.xlu1 %748 }
  0xef   : > { %v2190_v32 = vsel %vm1037_vm4, %v1016_v0, %v749_v22  ;;  %v747_v42 = vpop.permute.xlu0 %746  ;;  %v1069_v5 = vsel %vm1037_vm4, %v2164_v59, %v769_v6  ;;  %v2488_v6 = vld [vmem:[#allocation13_spill] sm:$0xff] }
  0xf0   : > { %v2194_v28 = vsel %vm1037_vm4, %v2054_v3, %v747_v42  ;;  %v2489_v22 = vld [vmem:[#allocation9_spill] sm:$0xff] }
  0xf4   : > { %844 = vrot.lane.b32.xlu2 %v1959_v12, %s1606_s24  ;;  %828 = vrot.lane.b32.xlu1 %v1923_v14, %s1606_s24 }
  0xf5   : > { %809 = vrot.lane.b32.xlu0 %v1860_v55, %s1605_s23 }
  0xf6   : > { %v800_v60 = vpop.permute.xlu2 %799  ;;  %v755_v10 = vpop.permute.xlu1 %754 }
  0xf7   : > { %v2203_v63 = vsel %vm1037_vm4, %v1022_v36, %v755_v10  ;;  %v753_v0 = vpop.permute.xlu0 %752 }
  0xfc   : > { %912 = vrot.lane.b32.xlu2 %v1797_v13, %s1607_s25  ;;  %881 = vrot.lane.b32.xlu1 %v1786_v58, %s1608_s26 }
  0xfd   : > { %865 = vrot.lane.b32.xlu0 %v1738_v8, %s1608_s26 }
  0xfe   : > { %v851_v3 = vpop.permute.xlu2 %850  ;;  %v761_v48 = vpop.permute.xlu1 %760 }
  0xff   : > { %v2212_v39 = vsel %vm1037_vm4, %v1028_v31, %v761_v48  ;;  %v759_v15 = vpop.permute.xlu0 %758 }
 0x100   : > { %v2216_v1 = vsel %vm1037_vm4, %v2078_v62, %v759_v15 }
 0x104   : > { %963 = vrot.lane.b32.xlu2 %v1981_v4, %s1609_s27  ;;  %947 = vrot.lane.b32.xlu1 %v1920_v11, %s1609_s27 }
 0x105   : > { %928 = vrot.lane.b32.xlu0 %v1857_v53, %s1607_s25 }
 0x106   : > { %v919_v8 = vpop.permute.xlu2 %918  ;;  %v2224_v58 = vpop.permute.xlu1 %766 }
 0x107   : > { %v765_v13 = vpop.permute.xlu0 %764 }
 0x108   : > { %v2228_v33 = vsel %vm1037_vm4, %v2093_v56, %v765_v13 }
 0x10c   : > { %826 = vrot.lane.b32.xlu2 %v1896_v44, %s1606_s24  ;;  %807 = vrot.lane.b32.xlu1 %v1863_v57, %s1605_s23 }
 0x10d   : > { %791 = vrot.lane.b32.xlu0 %v1702_v41, %s1605_s23 }
 0x10e   : > { %v970_v11 = vpop.permute.xlu2 %969  ;;  %v788_v53 = vpop.permute.xlu1 %787 }
 0x10f   : > { %v2237_v4 = vsel %vm1070_vm5, %v1041_v18, %v788_v53  ;;  %v786_v62 = vpop.permute.xlu0 %785  ;;  %v2487_v18 = vld [vmem:[#allocation2_spill] sm:$0xff] }
 0x110   : > { %v2241_v56 = vsel %vm1070_vm5, %v2110_v29, %v786_v62 }
 0x114   : > { %879 = vrot.lane.b32.xlu2 %v1802_v20, %s1608_s26  ;;  %863 = vrot.lane.b32.xlu1 %v1678_v16, %s1608_s26  ;;  %v1053_v20 = vsel %vm1037_vm4, %v2064_v50, %v753_v0  ;;  %v2486_v50 = vld [vmem:[#allocation4_spill] sm:$0xff] }
 0x115   : > { %842 = vrot.lane.b32.xlu0 %v2484_v49, %s1606_s24  ;;  %v1086_v19 = vsel %vm1070_vm5, %v1053_v20, %v800_v60 }
 0x116   : > { %v833_v36 = vpop.permute.xlu2 %832  ;;  %v835_v52 = vpop.permute.xlu1 %834 }
 0x117   : > { %v816_v54 = vpop.permute.xlu0 %815 }
 0x11c   : > { %945 = vrot.lane.b32.xlu2 %v1923_v14, %s1609_s27  ;;  %926 = vrot.lane.b32.xlu1 %v1860_v55, %s1607_s25  ;;  %v1119_v14 = vsel %vm1103_vm6, %v1086_v19, %v835_v52  ;;  %v1102_v55 = vsel %vm1070_vm5, %v1069_v5, %v816_v54  ;;  %v2492_v54 = vld [vmem:[#allocation10_spill] sm:$0xff] }
 0x11d   : > { %910 = vrot.lane.b32.xlu0 %v1729_v61, %s1607_s25  ;;  %v2485_v61 = vld [vmem:[#allocation5_spill] sm:$0xff]  ;;  %v1135_v47 = vsel %vm1103_vm6, %v1102_v55, %v851_v3  ;;  %v2493_v55 = vld [vmem:[#allocation7_spill] sm:$0xff] }
 0x11e   : > { %v886_v29 = vpop.permute.xlu2 %885  ;;  %v888_v16 = vpop.permute.xlu1 %887 }
 0x11f   : > { %v872_v25 = vpop.permute.xlu0 %871  ;;  %v1168_v40 = vsel %vm1136_vm7, %v1135_v47, %v888_v16 }
 0x120   : > { %v1152_v21 = vsel %vm1136_vm7, %v1119_v14, %v872_v25 }
 0x121   : > { %v1185_v9 = vsel %vm1169_vm8, %v1152_v21, %v919_v8  ;;  %v2490_v8 = vld [vmem:[#allocation6_spill] sm:$0xff] }
 0x124   : > { %805 = vrot.lane.b32.xlu2 %v2485_v61, %s1605_s23  ;;  %789 = vrot.lane.b32.xlu1 %v2486_v50, %s1605_s23 }
 0x125   : > { %961 = vrot.lane.b32.xlu0 %v1959_v12, %s1609_s27 }
 0x126   : > { %v952_v31 = vpop.permute.xlu2 %951  ;;  %v954_v51 = vpop.permute.xlu1 %953 }
 0x127   : > { %v935_v59 = vpop.permute.xlu0 %934  ;;  %v1218_v38 = vsel %vm1202_vm9, %v1185_v9, %v954_v51 }
 0x128   : > { %v1201_v17 = vsel %vm1169_vm8, %v1168_v40, %v935_v59  ;;  %v1260_v26 = vsel %vm1242_vm10, %v1218_v38, 0  ;;  %v1577_v40 = vld [vmem:[%s1655_s19 + $0x18] sm:$0xff]  ;;  %v2494_v59 = vld [vmem:[#allocation8_spill] sm:$0xff] }
 0x129   : > { %1278 = vmatpush.bf16.xpose.msra.mxu0 %v1260_v26  ;;  %v1234_v24 = vsel %vm1202_vm9, %v1201_v17, %v970_v11 }
 0x12a   : > { %v1276_v12 = vsel %vm1242_vm10, %v1234_v24, 0 }
 0x12b   : > { %1291 = vmatpush.bf16.xpose.msra.mxu1 %v1276_v12 }
 0x12c   : > { %861 = vrot.lane.b32.xlu2 %v2487_v18, %s1608_s26  ;;  %840 = vrot.lane.b32.xlu1 %v2488_v6, %s1606_s24 }
 0x12d   : > { %824 = vrot.lane.b32.xlu0 %v2489_v22, %s1606_s24 }
 0x12e   : > { %v812_v42 = vpop.permute.xlu2 %811  ;;  %v814_v60 = vpop.permute.xlu1 %813 }
 0x12f   : > { %v798_v10 = vpop.permute.xlu0 %797 }
 0x130   : > { %v1084_v15 = vsel %vm1070_vm5, %v2142_v45, %v798_v10  ;;  %v1067_v45 = vsel %vm1037_vm4, %v2167_v7, %v2224_v58 }
 0x134   : > { %924 = vrot.lane.b32.xlu2 %v1863_v57, %s1607_s25  ;;  %908 = vrot.lane.b32.xlu1 %v1702_v41, %s1607_s25  ;;  %v1117_v41 = vsel %vm1103_vm6, %v1084_v15, %v833_v36  ;;  %v2491_v36 = vld [vmem:[#allocation11_spill] sm:$0xff] }
 0x135   : > { %877 = vrot.lane.b32.xlu0 %v1819_v43, %s1608_s26 }
 0x136   : > { %v868_v0 = vpop.permute.xlu2 %867  ;;  %v870_v3 = vpop.permute.xlu1 %869 }
 0x137   : > { %v849_v48 = vpop.permute.xlu0 %848  ;;  %v1150_v43 = vsel %vm1136_vm7, %v1117_v41, %v870_v3 }
 0x13c   : > { %803 = vrot.lane.b32.xlu2 %v2490_v8, %s1605_s23  ;;  %959 = vrot.lane.b32.xlu1 %v2484_v49, %s1609_s27  ;;  %v1100_v49 = vsel %vm1070_vm5, %v1067_v45, %v814_v60 }
 0x13d   : > { %943 = vrot.lane.b32.xlu0 %v1896_v44, %s1609_s27  ;;  %v1133_v44 = vsel %vm1103_vm6, %v1100_v49, %v849_v48 }
 0x13e   : > { %v931_v57 = vpop.permute.xlu2 %930  ;;  %v933_v13 = vpop.permute.xlu1 %932  ;;  %v1166_v7 = vsel %vm1136_vm7, %v1133_v44, %v886_v29 }
 0x13f   : > { %v917_v11 = vpop.permute.xlu0 %916  ;;  %v1199_v20 = vsel %vm1169_vm8, %v1166_v7, %v933_v13 }
 0x140   : > { %v1183_v53 = vsel %vm1169_vm8, %v1150_v43, %v917_v11 }
 0x141   : > { %v1216_v62 = vsel %vm1202_vm9, %v1183_v53, %v952_v31 }
 0x142   : > { %v1258_v52 = vsel %vm1242_vm10, %v1216_v62, 0 }
 0x143   : > { %1279 = vmatpush.bf16.xpose.msra.mxu0 %v1258_v52 }
 0x144   : > { %859 = vrot.lane.b32.xlu2 %v1692_v30, %s1608_s26  ;;  %838 = vrot.lane.b32.xlu1 %v2491_v36, %s1606_s24 }
 0x145   : > { %822 = vrot.lane.b32.xlu0 %v2492_v54, %s1606_s24 }
 0x146   : > { %v796_v58 = vpop.permute.xlu1 %795  ;;  %v794_v16 = vpop.permute.xlu2 %793 }
 0x147   : > { %v968_v25 = vpop.permute.xlu0 %967  ;;  %v1080_v48 = vsel %vm1070_vm5, %v2194_v28, %v794_v16 }
 0x148   : > { %v1232_v19 = vsel %vm1202_vm9, %v1199_v20, %v968_v25 }
 0x149   : > { %v1274_v5 = vsel %vm1242_vm10, %v1232_v19, 0 }
 0x14a   : > { %1292 = vmatpush.bf16.xpose.msra.mxu1 %v1274_v5 }
 0x14c   : > { %922 = vrot.lane.b32.xlu2 %v2485_v61, %s1607_s25  ;;  %906 = vrot.lane.b32.xlu1 %v2486_v50, %s1607_s25  ;;  %v1098_v50 = vsel %vm1070_vm5, %v2228_v33, %v812_v42 }
 0x14d   : > { %875 = vrot.lane.b32.xlu0 %v1752_v27, %s1608_s26  ;;  %v1082_v27 = vsel %vm1070_vm5, %v2190_v32, %v796_v58 }
 0x14e   : > { %v847_v30 = vpop.permute.xlu1 %846  ;;  %v845_v14 = vpop.permute.xlu2 %844 }
 0x14f   : > { %v831_v29 = vpop.permute.xlu0 %830  ;;  %v1131_v31 = vsel %vm1103_vm6, %v1098_v50, %v847_v30 }
 0x150   : > { %v1115_v47 = vsel %vm1103_vm6, %v1082_v27, %v831_v29 }
 0x151   : > { %v1148_v33 = vsel %vm1136_vm7, %v1115_v47, %v868_v0 }
 0x154   : > { %801 = vrot.lane.b32.xlu2 %v2493_v55, %s1605_s23  ;;  %957 = vrot.lane.b32.xlu1 %v2488_v6, %s1609_s27 }
 0x155   : > { %941 = vrot.lane.b32.xlu0 %v2489_v22, %s1609_s27 }
 0x156   : > { %v915_v21 = vpop.permute.xlu1 %914  ;;  %v913_v51 = vpop.permute.xlu2 %912 }
 0x157   : > { %v884_v61 = vpop.permute.xlu0 %883  ;;  %v1181_v17 = vsel %vm1169_vm8, %v1148_v33, %v915_v21 }
 0x158   : > { %v1164_v9 = vsel %vm1136_vm7, %v1131_v31, %v884_v61 }
 0x159   : > { %v1197_v32 = vsel %vm1169_vm8, %v1164_v9, %v931_v57 }
 0x15c   : > { %857 = vrot.lane.b32.xlu2 %v1577_v40, %s1608_s26  ;;  %836 = vrot.lane.b32.xlu1 %v1941_v23, %s1606_s24  ;;  %v2495_v23 = vld [vmem:[#allocation3_spill] sm:$0xff] }
 0x15d   : > { %820 = vrot.lane.b32.xlu0 %v2494_v59, %s1606_s24 }
 0x15e   : > { %v966_v38 = vpop.permute.xlu1 %965  ;;  %v964_v22 = vpop.permute.xlu2 %963 }
 0x15f   : > { %v950_v26 = vpop.permute.xlu0 %949  ;;  %v1230_v24 = vsel %vm1202_vm9, %v1197_v32, %v966_v38 }
 0x160   : > { %v1214_v12 = vsel %vm1202_vm9, %v1181_v17, %v950_v26  ;;  %v1272_v18 = vsel %vm1242_vm10, %v1230_v24, 0 }
 0x161   : > { %v1256_v6 = vsel %vm1242_vm10, %v1214_v12, 0  ;;  %1293 = vmatpush.bf16.xpose.msra.mxu1 %v1272_v18 }
 0x162   : > { %1280 = vmatpush.bf16.xpose.msra.mxu0 %v1256_v6 }
 0x164   : > { %920 = vrot.lane.b32.xlu2 %v2490_v8, %s1607_s25  ;;  %904 = vrot.lane.b32.xlu1 %v2495_v23, %s1607_s25 }
 0x165   : > { %873 = vrot.lane.b32.xlu0 %v1759_v34, %s1608_s26 }
 0x166   : > { %v829_v42 = vpop.permute.xlu1 %828  ;;  %v827_v0 = vpop.permute.xlu2 %826 }
 0x167   : > { %v810_v60 = vpop.permute.xlu0 %809  ;;  %v1113_v15 = vsel %vm1103_vm6, %v1080_v48, %v829_v42 }
 0x168   : > { %v1096_v8 = vsel %vm1070_vm5, %v2176_v2, %v810_v60 }
 0x169   : > { %v1129_v57 = vsel %vm1103_vm6, %v1096_v8, %v845_v14 }
 0x16c   : > { %955 = vrot.lane.b32.xlu1 %v2491_v36, %s1609_s27 }
 0x16d   : > { %939 = vrot.lane.b32.xlu0 %v2492_v54, %s1609_s27 }
 0x16e   : > { %v882_v10 = vpop.permute.xlu1 %881  ;;  %v880_v62 = vpop.permute.xlu2 %879 }
 0x16f   : > { %v866_v3 = vpop.permute.xlu0 %865  ;;  %v1162_v43 = vsel %vm1136_vm7, %v1129_v57, %v882_v10 }
 0x170   : > { %v1146_v34 = vsel %vm1136_vm7, %v1113_v15, %v866_v3 }
 0x171   : > { %v1179_v13 = vsel %vm1169_vm8, %v1146_v34, %v913_v51 }
 0x176   : > { %v948_v41 = vpop.permute.xlu1 %947  ;;  %v946_v36 = vpop.permute.xlu2 %945 }
 0x177   : > { %v929_v11 = vpop.permute.xlu0 %928  ;;  %v1212_v53 = vsel %vm1202_vm9, %v1179_v13, %v948_v41 }
 0x178   : > { %v1195_v45 = vsel %vm1169_vm8, %v1162_v43, %v929_v11  ;;  %v1254_v28 = vsel %vm1242_vm10, %v1212_v53, 0 }
 0x179   : > { %1281 = vmatpush.bf16.xpose.msra.mxu0 %v1254_v28  ;;  %v1228_v2 = vsel %vm1202_vm9, %v1195_v45, %v964_v22 }
 0x17a   : > { %v1270_v49 = vsel %vm1242_vm10, %v1228_v2, 0 }
 0x17b   : > { %1294 = vmatpush.bf16.xpose.msra.mxu1 %v1270_v49 }
 0x17e   : > { %v808_v52 = vpop.permute.xlu1 %807  ;;  %v806_v20 = vpop.permute.xlu2 %805 }
 0x17f   : > { %v792_v44 = vpop.permute.xlu0 %791  ;;  %v1094_v14 = vsel %vm1070_vm5, %v2212_v39, %v808_v52  ;;  %v1092_v38 = vsel %vm1070_vm5, %v2216_v1, %v806_v20 }
 0x180   : > { %v1078_v58 = vsel %vm1070_vm5, %v2126_v46, %v792_v44 }
 0x181   : > { %v1111_v16 = vsel %vm1103_vm6, %v1078_v58, %v827_v0 }
 0x186   : > { %v864_v54 = vpop.permute.xlu1 %863  ;;  %v862_v50 = vpop.permute.xlu2 %861 }
 0x187   : > { %v843_v7 = vpop.permute.xlu0 %842  ;;  %v1144_v19 = vsel %vm1136_vm7, %v1111_v16, %v864_v54 }
 0x188   : > { %v1127_v21 = vsel %vm1103_vm6, %v1094_v14, %v843_v7 }
 0x189   : > { %v1160_v46 = vsel %vm1136_vm7, %v1127_v21, %v880_v62 }
 0x18e   : > { %v927_v25 = vpop.permute.xlu1 %926  ;;  %v925_v39 = vpop.permute.xlu2 %924 }
 0x18f   : > { %v911_v5 = vpop.permute.xlu0 %910  ;;  %v1193_v27 = vsel %vm1169_vm8, %v1160_v46, %v927_v25 }
 0x190   : > { %v1177_v30 = vsel %vm1169_vm8, %v1144_v19, %v911_v5 }
 0x191   : > { %v1210_v29 = vsel %vm1202_vm9, %v1177_v30, %v946_v36  ;;  %v1610_v36 = vmov 0  }
 0x192   : > { %v1252_v55 = vsel %vm1242_vm10, %v1210_v29, 0  ;;  %1575 = vset.pattern.permute.xlu2 %v1610_v36  ;;  %1576 = vset.pattern.permute.xlu0 %v1610_v36 }
 0x193   : > { %1282 = vmatpush.bf16.xpose.msra.mxu0 %v1252_v55 }
 0x196   : > { %v790_v61 = vpop.permute.xlu1 %789  ;;  %v804_v26 = vpop.permute.xlu2 %803 }
 0x197   : > { %v962_v31 = vpop.permute.xlu0 %961  ;;  %v1076_v32 = vsel %vm1070_vm5, %v2179_v35, %v790_v61  ;;  %v1090_v57 = vsel %vm1070_vm5, %v2158_v37, %v804_v26 }
 0x198   : > { %v1226_v47 = vsel %vm1202_vm9, %v1193_v27, %v962_v31  ;;  %v1235_v31 = vld [vmem:[%s2449_s1] sm:$0xf] }
 0x199   : > { %v1268_v51 = vsel %vm1242_vm10, %v1226_v47, 0 }
 0x19a   : > { %1295 = vmatpush.bf16.xpose.msra.mxu1 %v1268_v51 }
 0x19e   : > { %v841_v9 = vpop.permute.xlu1 %840  ;;  %v860_v0 = vpop.permute.xlu2 %859 }
 0x19f   : > { %v825_v40 = vpop.permute.xlu0 %824  ;;  %v1125_v17 = vsel %vm1103_vm6, %v1092_v38, %v841_v9 }
 0x1a0   : > { %v1109_v24 = vsel %vm1103_vm6, %v1076_v32, %v825_v40 }
 0x1a1   : > { %v1142_v18 = vsel %vm1136_vm7, %v1109_v24, %v862_v50 }
 0x1a6   : > { %v909_v59 = vpop.permute.xlu1 %908  ;;  %v923_v8 = vpop.permute.xlu2 %922 }
 0x1a7   : > { %v878_v33 = vpop.permute.xlu0 %877  ;;  %v1175_v22 = vsel %vm1169_vm8, %v1142_v18, %v909_v59 }
 0x1a8   : > { %v1158_v12 = vsel %vm1136_vm7, %v1125_v17, %v878_v33 }
 0x1a9   : > { %v1191_v23 = vsel %vm1169_vm8, %v1158_v12, %v925_v39 }
 0x1ae   : > { %v960_v6 = vpop.permute.xlu1 %959  ;;  %v802_v52 = vpop.permute.xlu2 %801 }
 0x1af   : > { %v944_v42 = vpop.permute.xlu0 %943  ;;  %v1224_v1 = vsel %vm1202_vm9, %v1191_v23, %v960_v6  ;;  %v1088_v25 = vsel %vm1070_vm5, %v2203_v63, %v802_v52 }
 0x1b0   : > { %v1208_v60 = vsel %vm1202_vm9, %v1175_v22, %v944_v42  ;;  %v1266_v35 = vsel %vm1242_vm10, %v1224_v1, 0 }
 0x1b1   : > { %v1250_v10 = vsel %vm1242_vm10, %v1208_v60, 0  ;;  %1296 = vmatpush.bf16.xpose.msra.mxu1 %v1266_v35 }
 0x1b2   : > { %1283 = vmatpush.bf16.xpose.msra.mxu0 %v1250_v10 }
 0x1b6   : > { %v839_v3 = vpop.permute.xlu1 %838  ;;  %v858_v58 = vpop.permute.xlu2 %857 }
 0x1b7   : > { %v823_v48 = vpop.permute.xlu0 %822  ;;  %v1123_v41 = vsel %vm1103_vm6, %v1090_v57, %v839_v3 }
 0x1b8   : > { %v1107_v13 = vsel %vm1103_vm6, %v2237_v4, %v823_v48  ;;  %v1236_v4 = vld [vmem:[%s2450_s2] sm:$0xff] }
 0x1b9   : > { %v1140_v11 = vsel %vm1136_vm7, %v1107_v13, %v860_v0  ;;  %1239 = vperm.xlu2 %1575, %v1236_v4  }
 0x1be   : > { %v907_v15 = vpop.permute.xlu1 %906  ;;  %v921_v29 = vpop.permute.xlu2 %920 }
 0x1bf   : > { %v876_v34 = vpop.permute.xlu0 %875  ;;  %v1173_v28 = vsel %vm1169_vm8, %v1140_v11, %v907_v15 }
 0x1c0   : > { %v1156_v43 = vsel %vm1136_vm7, %v1123_v41, %v876_v34 }
 0x1c1   : > { %v1189_v45 = vsel %vm1169_vm8, %v1156_v43, %v923_v8 }
 0x1c6   : > { %v958_v53 = vpop.permute.xlu1 %957 }
 0x1c7   : > { %v942_v62 = vpop.permute.xlu0 %941  ;;  %v1222_v2 = vsel %vm1202_vm9, %v1189_v45, %v958_v53 }
 0x1c8   : > { %v1206_v49 = vsel %vm1202_vm9, %v1173_v28, %v942_v62  ;;  %v1264_v37 = vsel %vm1242_vm10, %v1222_v2, 0 }
 0x1c9   : > { %v1248_v44 = vsel %vm1242_vm10, %v1206_v49, 0  ;;  %1297 = vmatpush.bf16.xpose.msra.mxu1 %v1264_v37 }
 0x1ca   : > { %1284 = vmatpush.bf16.xpose.msra.mxu0 %v1248_v44 }
 0x1ce   : > { %v837_v54 = vpop.permute.xlu1 %836 }
 0x1cf   : > { %v821_v7 = vpop.permute.xlu0 %820  ;;  %v1121_v19 = vsel %vm1103_vm6, %v1088_v25, %v837_v54 }
 0x1d0   : > { %v1105_v5 = vsel %vm1103_vm6, %v2241_v56, %v821_v7 }
 0x1d1   : > { %v1138_v14 = vsel %vm1136_vm7, %v1105_v5, %v858_v58 }
 0x1d6   : > { %v905_v20 = vpop.permute.xlu1 %904 }
 0x1d7   : > { %v874_v16 = vpop.permute.xlu0 %873  ;;  %v1171_v46 = vsel %vm1169_vm8, %v1138_v14, %v905_v20 }
 0x1d8   : > { %v1154_v30 = vsel %vm1136_vm7, %v1121_v19, %v874_v16 }
 0x1d9   : > { %v1187_v55 = vsel %vm1169_vm8, %v1154_v30, %v921_v29 }
 0x1de   : > { %v956_v21 = vpop.permute.xlu1 %955 }
 0x1df   : > { %v940_v61 = vpop.permute.xlu0 %939  ;;  %v1220_v50 = vsel %vm1202_vm9, %v1187_v55, %v956_v21 }
 0x1e0   : > { %v1204_v63 = vsel %vm1202_vm9, %v1171_v46, %v940_v61  ;;  %v1262_v27 = vsel %vm1242_vm10, %v1220_v50, 0 }
 0x1e1   : > { %v1246_v56 = vsel %vm1242_vm10, %v1204_v63, 0  ;;  %1298 = vmatpush.bf16.xpose.msra.mxu1 %v1262_v27 }
 0x1e2   : > { %1285 = vmatpush.bf16.xpose.msra.mxu0 %v1246_v56 }
 0x1e8   : > { %1519 = vmatmul.msk.bf16.vlgmr.msra.gmra.mxu1 %vm1242_vm10, %v1235_v31 }
 0x1e9   : > { %1518 = vmatmul.msk.bf16.vlgmr.msra.gmra.mxu0 %vm1242_vm10, %v1235_v31 }
 0x213   : > { %v1240_v47 = vpop.permute.xlu2 %1239 }
 0x265   : > { %v1300_v51 = vpop.f32.mrf.mxu1 }
 0x266   : > { %v1287_v9 = vpop.f32.mrf.mxu0  ;;  %v1301_v40 = vadd.f32 %v1300_v51, %v1240_v47 }
 0x267   : > { %v1288_v39 = vadd.f32 %v1287_v9, %v1240_v47 }
 0x268   : > { %1305 = vst [vmem:[%s243_s8 + $0x8] sm:$0xff] %v1301_v40 }
 0x269   : > { %1304 = vst [vmem:[%s243_s8] sm:$0xff] %v1288_v39 }
 0x26d   : > { %v1302_v59 = vpop.f32.mrf.mxu1 }
 0x26e   : > { %v1289_v33 = vpop.f32.mrf.mxu0 }
 0x26f PF: > { %s13_s14 = sadd.s32 1, %s1600_s14   ;;  %s2496_s12 = smov %s1596_s13 }
 0x270   : > { %p10_p5 = scmp.ge.s32.totalorder %s13_s14, 4   ;;  %s2497_s13 = smov %s2499_s15 }
 0x272   :  { %12 = sbr.rel (!%p10_p5) target bundleno = 2 (0x2), region = 68 }

</bundles_post_ra>
